<compile_context>
chip_gen: v5e
topology: v5e:2x2
jax: 0.10.0
libtpu: 0.0.40
codegen_flags: <defaults>
</compile_context>

<pallas_src>
import functools

import jax
import jax.numpy as jnp
from jax import lax
from jax.experimental import pallas as pl
from jax.experimental.pallas import tpu as pltpu

POWER = 0.2
LANES = 128
SUBLANES = 8
ACC_ROWS = 32          # 4 * SUBLANES -> 8 independent f32 accumulator vregs (ILP)
STRIP_ROWS = 256       # rows per inner-loop step (~32 vregs of temporaries per op)
MAX_ROW_TILE = 8192    # 8192 * 128 * 4 B = 4 MiB f32 tile (8 MiB double-buffered)


def _sparsity_kernel(x_ref, o_ref, *, row_tile, strip_rows, acc_rows, valid_rows):
    n_strips = row_tile // strip_rows
    # Only the last tile can be partial; if rows divide the tile, skip masking entirely.
    need_row_mask = (valid_rows % row_tile) != 0

    compute_dtype = (jnp.bfloat16
                     if jnp.dtype(x_ref.dtype) == jnp.dtype(jnp.bfloat16)
                     else jnp.float32)

    tile_row0 = pl.program_id(0) * row_tile
    if need_row_mask:
        strip_iota = lax.broadcasted_iota(jnp.int32, (strip_rows, LANES), 0)

    def strip_body(s, acc):
        start = pl.multiple_of(s * strip_rows, strip_rows)
        v = jnp.abs(x_ref[pl.ds(start, strip_rows), :].astype(compute_dtype))
        # pow -> exp(0.2 * log|x|) on the EUP (bf16 EUP path when the input is bf16).
        pv = (v ** POWER).astype(jnp.float32)
        keep = v > 0                      # guards pow(0, 0.2) lowering edge cases
        if need_row_mask:
            # Mask rows beyond the true row count (stale VMEM in the partial tile).
            keep = keep & ((tile_row0 + start + strip_iota) < valid_rows)
        pv = jnp.where(keep, pv, 0.0)
        # Fold the strip into acc_rows independent accumulator rows (pure VPU adds;
        # the cross-lane/sublane reduce is deferred to the wrapper).
        return acc + jnp.sum(pv.reshape(strip_rows // acc_rows, acc_rows, LANES),
                             axis=0)

    acc0 = jnp.zeros((acc_rows, LANES), jnp.float32)
    o_ref[...] = lax.fori_loop(0, n_strips, strip_body, acc0,
                               unroll=min(4, n_strips))


def _plain_pow_sum(v):
    """Tiny plain-JAX fallback for tails / very small inputs."""
    a = jnp.abs(v.astype(jnp.float32))
    return jnp.sum(jnp.where(a > 0, a ** POWER, 0.0), dtype=jnp.float32)


def sparsity_loss(kernel: jax.Array) -> jax.Array:
    """Pallas equivalent of SparsityLoss().forward(kernel): mean(|kernel| ** 0.2)."""
    flat = jnp.ravel(kernel)
    n_elem = flat.size
    if n_elem == 0:
        return jnp.float32(0.0)

    rows = n_elem // LANES          # complete 128-lane rows
    main_elems = rows * LANES

    total = jnp.float32(0.0)

    if rows >= SUBLANES:
        # Reshape is free when numel % 128 == 0; otherwise only the <128-elem lane
        # tail is split off (handled below in plain JAX).
        main = flat if main_elems == n_elem else flat[:main_elems]
        x2d = main.reshape(rows, LANES)

        if rows >= STRIP_ROWS:
            row_tile = min(MAX_ROW_TILE, (rows // STRIP_ROWS) * STRIP_ROWS)
            strip_rows = STRIP_ROWS
            acc_rows = ACC_ROWS
        else:
            row_tile = (rows // SUBLANES) * SUBLANES   # multiple of 8, <= rows
            strip_rows = row_tile
            acc_rows = SUBLANES
        n_tiles = -(-rows // row_tile)                 # cdiv; last tile may be partial

        itemsize = jnp.dtype(kernel.dtype).itemsize
        partial = pl.pallas_call(
            functools.partial(_sparsity_kernel, row_tile=row_tile,
                              strip_rows=strip_rows, acc_rows=acc_rows,
                              valid_rows=rows),
            out_shape=jax.ShapeDtypeStruct((n_tiles * acc_rows, LANES), jnp.float32),
            grid_spec=pltpu.PrefetchScalarGridSpec(
                num_scalar_prefetch=0,
                grid=(n_tiles,),
                in_specs=[pl.BlockSpec((row_tile, LANES), lambda i: (i, 0))],
                # Each tile owns its own partial-sum block -> the grid axis is truly
                # parallel (sharded across TensorCores on v7x).
                out_specs=pl.BlockSpec((acc_rows, LANES), lambda i: (i, 0)),
            ),
            compiler_params=pltpu.CompilerParams(
                dimension_semantics=("parallel",),
                vmem_limit_bytes=32 * 1024 * 1024,   # headroom for v5e's 16 MiB default
            ),
            cost_estimate=pl.CostEstimate(
                flops=5 * main_elems,
                transcendentals=2 * main_elems,        # pow = log + exp on the EUP
                bytes_accessed=main_elems * itemsize
                               + n_tiles * acc_rows * LANES * 4,
            ),
        )(x2d)
        total = total + jnp.sum(partial, dtype=jnp.float32)
    else:
        # Fewer than 8 full lane-rows: not worth a kernel launch.
        main_elems = 0

    if main_elems != n_elem:
        total = total + _plain_pow_sum(flat[main_elems:])

    # Mean over the true element count (masked / tail elements contributed exactly 0).
    return (total / jnp.float32(n_elem)).astype(jnp.float32)


if __name__ == "__main__":
    key = jax.random.PRNGKey(0)
    k_main, k_big = jax.random.split(key)

    # Small NCHW-like conv weight, consistent with the module's use as a kernel penalty.
    x = jax.random.normal(k_main, (2, 4, 16, 16), dtype=jnp.float32)
    out = sparsity_loss(x)
    jax.block_until_ready(out)
    ref = jnp.mean(jnp.abs(x) ** POWER)
    assert jnp.allclose(out, ref, rtol=1e-4, atol=1e-6), (out, ref)

    # Extra check: multi-tile "parallel" grid with a partial last tile
    # (exercises the in-kernel row masking path; rows=300, row_tile=256).
    x2 = jax.random.normal(k_big, (3, 100, 128), dtype=jnp.float32)
    out2 = sparsity_loss(x2)
    jax.block_until_ready(out2)
    ref2 = jnp.mean(jnp.abs(x2) ** POWER)
    assert jnp.allclose(out2, ref2, rtol=1e-4, atol=1e-6), (out2, ref2)

    print("KERNEL_OK")
</pallas_src>

<mosaic_0001>
module attributes {stable_mosaic.version = 11 : i64} {
  func.func @_sparsity_kernel(%arg0: i32, %arg1: memref<16x128xf32, #tpu.memory_space<vmem>>, %arg2: memref<8x128xf32, #tpu.memory_space<vmem>>) attributes {dimension_semantics = [#tpu.dimension_semantics<parallel>], iteration_bounds = array<i64: 1>, scalar_prefetch = 0 : i64, scratch_operands = 0 : i64, tpu.core_type = #tpu.core_type<tc>, window_params = [{transform_indices = @transform_0, window_bounds = array<i64: 16, 128>}, {transform_indices = @transform_1, window_bounds = array<i64: 8, 128>}]} {
    %cst = arith.constant 0.000000e+00 : f32
    %0 = vector.broadcast %cst : f32 to vector<8x128xf32>
    %c0_i32 = arith.constant 0 : i32
    %c16_i32 = arith.constant 16 : i32
    %1 = arith.muli %c0_i32, %c16_i32 : i32
    %2 = tpu.assume_multiple %1, 16 : i32
    %3 = arith.index_cast %2 : i32 to index
    %c0 = arith.constant 0 : index
    %4 = vector.load %arg1[%3, %c0] : memref<16x128xf32, #tpu.memory_space<vmem>>, vector<16x128xf32>
    %5 = math.absf %4 : vector<16x128xf32>
    %cst_0 = arith.constant 2.000000e-01 : f32
    %6 = vector.broadcast %cst_0 : f32 to vector<16x128xf32>
    %7 = math.powf %5, %6 : vector<16x128xf32>
    %cst_1 = arith.constant 0.000000e+00 : f32
    %8 = vector.broadcast %cst_1 : f32 to vector<16x128xf32>
    %9 = arith.cmpf ogt, %5, %8 : vector<16x128xf32>
    %cst_2 = arith.constant 0.000000e+00 : f32
    %10 = vector.broadcast %cst_2 : f32 to vector<16x128xf32>
    %11 = arith.select %9, %7, %10 : vector<16x128xi1>, vector<16x128xf32>
    %12 = vector.shape_cast %11 : vector<16x128xf32> to vector<2x8x128xf32>
    %cst_3 = arith.constant dense<0.000000e+00> : vector<8x128xf32>
    %13 = vector.multi_reduction <add>, %12, %cst_3 [0] : vector<2x8x128xf32> to vector<8x128xf32>
    %14 = arith.addf %0, %13 : vector<8x128xf32>
    %c1_i32 = arith.constant 1 : i32
    %c0_4 = arith.constant 0 : index
    %c0_5 = arith.constant 0 : index
    %15 = vector.load %arg2[%c0_4, %c0_5] : memref<8x128xf32, #tpu.memory_space<vmem>>, vector<8x128xf32>
    tpu.vector_store %arg2[%c0_4, %c0_5], %14 {strides = array<i32>} : memref<8x128xf32, #tpu.memory_space<vmem>>, vector<8x128xf32>,
    return
  }
  func.func @transform_0(%arg0: i32) -> (i32, i32) {
    %c0_i32 = arith.constant 0 : i32
    %c0_i32_0 = arith.constant 0 : i32
    return %arg0, %c0_i32 : i32, i32
  }
  func.func @transform_1(%arg0: i32) -> (i32, i32) {
    %c0_i32 = arith.constant 0 : i32
    %c0_i32_0 = arith.constant 0 : i32
    return %arg0, %c0_i32 : i32, i32
  }
}

</mosaic_0001>

<bundles_post_ra>
// kernel: tpu_custom_call.1
= control target key start
LH: loop header
LB: loop body
LE: loop exit
PB: predicated region body
PF: predicated region fallthrough
CT: control target
= control target key end

     0   :  { %6 = vsyncpa [#allocation3], 0  ;;  %s311_s0 = inlined_call_operand.hbm [shape: f32[16,128], index: 0, kind: input, shape index: {}]   ;;  %s312_s1 = inlined_call_operand.hbm [shape: f32[8,128], index: 1, kind: output, shape index: {}]  }
   0x1   :  { %7 = vsyncpa [#allocation4], 0  ;;  %s12_s8 = sshll.u32 %s311_s0, 4  ;;  %s255_s9 = smov [#allocation2]   ;;  %s13_s8 = int_to_ptr.hbm [resolvable:$true] %s12_s8 }
   0x2   :  { %s14_s10 = sshll.u32 %s255_s9, 4  ;;  %s256_s11 = smov 128   ;;  %s15_s10 = int_to_ptr.vmem [resolvable:$true] %s14_s10 }
   0x3   :  { %s257_s12 = smov 8  }
   0x4   :  { %20 = dma.hbm_to_vmem [thread:$0]  %s13_s8, 256, %s15_s10, [#allocation3], %s256_s11, %s256_s11, %s257_s12  }
   0x5   :  { %251 = dma.done.wait [#allocation3], 256  }
   0x6   :  { %252 = vsyncadd [#allocation3], 4294967040  ;;  %v25_v0 = vld [vmem:[#allocation2] sm:$0xff]  ;;  %v26_v1 = vld [vmem:[#allocation2 + $0x8] sm:$0xff]  ;;  %s258_s0 = smov [#allocation5]   ;;  %s45_s16 = sshll.u32 %s312_s1, 4  ;;  %s46_s16 = int_to_ptr.hbm [resolvable:$true] %s45_s16 }
   0x7   :  { %v272_v2 = vand.u32 2147483647, %v25_v0  ;;  %v274_v3 = vand.u32 2147483647, %v26_v1  ;;  %s43_s13 = sshll.u32 %s258_s0, 4  ;;  %s44_s13 = int_to_ptr.vmem [resolvable:$true] %s43_s13 }
   0x9   :  { %v65_v4 = vand.u32 8388607, %v272_v2  ;;  %v135_v5 = vand.u32 8388607, %v274_v3  ;;  %v61_v17 = vand.u32 2139095040, %v272_v2  ;;  %v131_v20 = vand.u32 2139095040, %v274_v3 }
   0xa   :  { %vm99_vm2 = vweird.f32 %v272_v2  ;;  %vm98_vm3 = vcmp.lt.f32.partialorder %v272_v2, 0.0  ;;  %vm169_vm4 = vweird.f32 %v274_v3  ;;  %vm97_vm5 = vcmp.eq.f32.partialorder %v272_v2, 0.0 }
   0xb   :  { %v66_v6 = vor.u32 8388608, %v65_v4  ;;  %v136_v7 = vor.u32 8388608, %v135_v5  ;;  %v62_v24 = vshrl.u32 %v61_v17, 23  ;;  %v132_v29 = vshrl.u32 %v131_v20, 23 }
   0xc   :  { %vm168_vm6 = vcmp.lt.f32.partialorder %v274_v3, 0.0  ;;  %vm96_vm7 = vcmp.eq.f32.partialorder %v272_v2, 1.0  ;;  %vm167_vm8 = vcmp.eq.f32.partialorder %v274_v3, 0.0  ;;  %vm166_vm9 = vcmp.eq.f32.partialorder %v274_v3, 1.0 }
   0xd   :  { %v68_v8 = vand.u32 8388607, %v66_v6  ;;  %v138_v9 = vand.u32 8388607, %v136_v7  ;;  %v123_v34 = vadd.s32 4294967169, %v62_v24  ;;  %v193_v39 = vadd.s32 4294967169, %v132_v29 }
   0xe   :  { %vm106_vm10 = vcmp.lt.f32.partialorder %v272_v2, 0  ;;  %vm107_vm11 = vcmp.eq.f32.partialorder %v272_v2, 0  ;;  %vm176_vm12 = vcmp.lt.f32.partialorder %v274_v3, 0  ;;  %vm110_vm13 = vcmp.eq.f32.partialorder %v272_v2, 2139095040 }
   0xf   :  { %v69_v10 = vor.u32 1065353216, %v68_v8  ;;  %v139_v11 = vor.u32 1065353216, %v138_v9  ;;  %v73_v44 = vadd.s32 1, %v123_v34  ;;  %v143_v49 = vadd.s32 1, %v193_v39 }
  0x10   :  { %vm177_vm14 = vcmp.eq.f32.partialorder %v274_v3, 0  ;;  %vm118_vm15 = vcmp.ne.f32.partialorder %v272_v2, %v272_v2 }
  0x11   :  { %vm70_vm0 = vcmp.ge.f32.partialorder %v69_v10, 1.4142135  ;;  %v71_v12 = vmul.f32 0.5, %v69_v10  ;;  %vm140_vm1 = vcmp.ge.f32.partialorder %v139_v11, 1.4142135  ;;  %v141_v13 = vmul.f32 0.5, %v139_v11 }
  0x12   :  { %v74_v54 = vsel %vm70_vm0, %v73_v44, %v123_v34  ;;  %v144_v58 = vsel %vm140_vm1, %v143_v49, %v193_v39 }
  0x13   :  { %v72_v14 = vsel %vm70_vm0, %v71_v12, %v69_v10  ;;  %v142_v15 = vsel %vm140_vm1, %v141_v13, %v139_v11  ;;  %v94_v61 = vcvt.s32.f32 %v74_v54  ;;  %v164_v63 = vcvt.s32.f32 %v144_v58 }
  0x14   :  { %v124_v16 = vadd.f32 -1.0, %v72_v14  ;;  %v194_v18 = vadd.f32 -1.0, %v142_v15  ;;  %vm180_vm0 = vcmp.eq.f32.partialorder %v274_v3, 2139095040  ;;  %vm108_vm1 = vcmp.eq.f32.partialorder %v272_v2, 1065353216 }
  0x16   :  { %v76_v19 = vmul.f32 %v124_v16, %v124_v16  ;;  %v146_v21 = vmul.f32 %v194_v18, %v194_v18 }
  0x18   :  { %v77_v22 = vmul.f32 0.12621109, %v76_v19  ;;  %v79_v23 = vmul.f32 -0.20706727, %v76_v19  ;;  %v147_v25 = vmul.f32 0.12621109, %v146_v21 }
  0x19   :  { %v149_v26 = vmul.f32 -0.20706727, %v146_v21 }
  0x1a   :  { %v78_v27 = vadd.f32 0.21545328, %v77_v22  ;;  %v80_v28 = vadd.f32 -0.23896284, %v79_v23  ;;  %v148_v30 = vadd.f32 0.21545328, %v147_v25 }
  0x1b   :  { %v150_v31 = vadd.f32 -0.23896284, %v149_v26 }
  0x1c   :  { %v81_v32 = vmul.f32 %v78_v27, %v76_v19  ;;  %v83_v33 = vmul.f32 %v80_v28, %v76_v19  ;;  %v151_v35 = vmul.f32 %v148_v30, %v146_v21 }
  0x1d   :  { %v153_v36 = vmul.f32 %v150_v31, %v146_v21 }
  0x1e   :  { %v82_v37 = vadd.f32 0.28795174, %v81_v32  ;;  %v84_v38 = vadd.f32 -0.3607037, %v83_v33  ;;  %v152_v40 = vadd.f32 0.28795174, %v151_v35 }
  0x1f   :  { %v154_v41 = vadd.f32 -0.3607037, %v153_v36 }
  0x20   :  { %v85_v42 = vmul.f32 %v82_v37, %v76_v19  ;;  %v87_v43 = vmul.f32 %v84_v38, %v76_v19  ;;  %v155_v45 = vmul.f32 %v152_v40, %v146_v21 }
  0x21   :  { %v157_v46 = vmul.f32 %v154_v41, %v146_v21 }
  0x22   :  { %v86_v47 = vadd.f32 0.48090908, %v85_v42  ;;  %v88_v48 = vadd.f32 -0.72134733, %v87_v43  ;;  %v156_v50 = vadd.f32 0.48090908, %v155_v45 }
  0x23   :  { %v158_v51 = vadd.f32 -0.72134733, %v157_v46 }
  0x24   :  { %v89_v52 = vmul.f32 %v86_v47, %v76_v19  ;;  %v91_v53 = vmul.f32 %v124_v16, %v88_v48  ;;  %v159_v55 = vmul.f32 %v156_v50, %v146_v21 }
  0x25   :  { %v161_v56 = vmul.f32 %v194_v18, %v158_v51 }
  0x26   :  { %v90_v57 = vadd.f32 1.442695, %v89_v52  ;;  %v160_v59 = vadd.f32 1.442695, %v159_v55 }
  0x28   :  { %v92_v60 = vadd.f32 %v91_v53, %v90_v57  ;;  %v162_v62 = vadd.f32 %v161_v56, %v160_v59 }
  0x2a   :  { %v93_v0 = vmul.f32 %v124_v16, %v92_v60  ;;  %v163_v1 = vmul.f32 %v194_v18, %v162_v62 }
  0x2c   :  { %v95_v4 = vadd.f32 %v94_v61, %v93_v0  ;;  %v165_v5 = vadd.f32 %v164_v63, %v163_v1 }
  0x2e   :  { %v100_v6 = vsel %vm99_vm2, %v272_v2, %v95_v4  ;;  %v170_v8 = vsel %vm169_vm4, %v274_v3, %v165_v5  ;;  %vm188_vm2 = vcmp.ne.f32.partialorder %v274_v3, %v274_v3  ;;  %vm31_vm4 = vcmp.gt.f32.partialorder %v272_v2, 0.0 }
  0x2f   :  { %v101_v7 = vsel %vm98_vm3, nan, %v100_v6  ;;  %v171_v10 = vsel %vm168_vm6, nan, %v170_v8  ;;  %vm178_vm3 = vcmp.eq.f32.partialorder %v274_v3, 1065353216 }
  0x30   :  { %v102_v9 = vsel %vm97_vm5, -inf, %v101_v7  ;;  %v172_v12 = vsel %vm167_vm8, -inf, %v171_v10  ;;  %vm32_vm5 = vcmp.gt.f32.partialorder %v274_v3, 0.0 }
  0x31   :  { %v103_v11 = vsel %vm96_vm7, 0.0, %v102_v9  ;;  %v173_v14 = vsel %vm166_vm9, 0.0, %v172_v12 }
  0x32   :  { %v104_v13 = vmul.f32 0.2, %v103_v11  ;;  %v174_v15 = vmul.f32 0.2, %v173_v14 }
  0x34   :  { %199 = vpow2.f32 %v104_v13 }
  0x35   :  { %201 = vpow2.f32 %v174_v15 }
  0x3a   :  { %v200_v16 = vpop.eup %199 }
  0x3b   :  { %v202_v17 = vpop.eup %201  ;;  %v111_v18 = vsel %vm106_vm10, 2143289344, %v200_v16 }
  0x3c   :  { %v112_v19 = vsel %vm107_vm11, 0, %v111_v18  ;;  %v181_v20 = vsel %vm176_vm12, 2143289344, %v202_v17 }
  0x3d   :  { %v117_v21 = vsel %vm110_vm13, 2139095040, %v112_v19  ;;  %v182_v22 = vsel %vm177_vm14, 0, %v181_v20 }
  0x3e   :  { %v121_v23 = vsel %vm118_vm15, 2143289344, %v117_v21  ;;  %v187_v24 = vsel %vm180_vm0, 2139095040, %v182_v22 }
  0x3f   :  { %v122_v25 = vsel %vm108_vm1, 1065353216, %v121_v23  ;;  %v191_v26 = vsel %vm188_vm2, 2143289344, %v187_v24 }
  0x40   :  { %v192_v27 = vsel %vm178_vm3, 1065353216, %v191_v26  ;;  %v33_v28 = vsel %vm31_vm4, %v122_v25, 0.0 }
  0x41   :  { %v34_v29 = vsel %vm32_vm5, %v192_v27, 0.0 }
  0x42   :  { %v35_v30 = vadd.f32 %v34_v29, %v33_v28 }
  0x44   :  { %37 = vst [vmem:[#allocation5] sm:$0xff] %v35_v30 }
  0x45   :  { %48 = dma.vmem_to_hbm [thread:$0]  %s44_s13, 128, %s46_s16, [#allocation4]  }
  0x46   :  { %253 = dma.done.wait [#allocation4], 128  }
  0x47   :  { %254 = vsyncadd [#allocation4], 4294967168 }
  0x48   :  { %53 = vsyncpa [#allocation3], 1 }
  0x49   :  { %54 = vsyncpa [#allocation4], 1 }

</bundles_post_ra>
